<compile_context>
chip_gen: v7x
topology: tpu7x:2x2x1
jax: 0.10.0
libtpu: 0.0.40
codegen_flags: <defaults>
</compile_context>

<pallas_src>
import functools

import numpy as np
import jax
import jax.numpy as jnp
from jax.experimental import pallas as pl
from jax.experimental.pallas import tpu as pltpu


def _round_up(x, m):
    return (x + m - 1) // m * m


def _largest_divisor_leq(n, cap):
    cap = max(1, min(n, int(cap)))
    for d in range(cap, 0, -1):
        if n % d == 0:
            return d
    return 1


def _pick_row_tile(H, W, cin_p, cout, budget_bytes=4 * 1024 * 1024):
    # Bytes per output row of the per-step working set (out tile dbl-buffered,
    # im2col slab + copies, f32 accumulator).  Sized so v7x (64 MiB VMEM) has headroom.
    per_row = (2 * 2 * W * 2 * cout * 4        # output tile (f32, double buffered)
               + 3 * W * 6 * cin_p * 2         # im2col slab + shifted-slice copies (bf16)
               + 2 * W * 2 * cout * 4)         # f32 accumulator
    return _largest_divisor_leq(H, max(1, budget_bytes // max(1, per_row)))


def _up_conv_kernel(xp_ref, w_ref, shift_ref, o_ref, *, TA, W, Cin_p, Cout):
    # xp_ref:    (1, H+2, W+2, Cin_p)   zero-padded ORIGINAL-res input (compute dtype)
    # w_ref:     (2, 6*Cin_p, 2*Cout)   premixed weights, first dim = output row parity
    # shift_ref: (1, 2*Cout)            folded conv-bias + BN shift (f32)
    # o_ref:     (TA, 2, W, 2*Cout)     out row tile; dim1 = row parity,
    #                                   last dim = (col parity, Cout) interleaved
    j = pl.program_id(1)
    a0 = j * TA
    # TA+2 input rows cover both row parities of this output-row tile (+1 halo).
    slab = xp_ref[0, pl.ds(a0, TA + 2), :, :]                 # (TA+2, W+2, Cin_p)

    for ry in range(2):                                       # static unroll, 2 parities
        # im2col slab; K-axis order (row tap i, col tap q, ci) matches weight prep.
        pieces = [slab[ry + i:ry + i + TA, q:q + W, :]
                  for i in range(2) for q in range(3)]
        patches = jnp.concatenate(pieces, axis=-1)            # (TA, W, 6*Cin_p)
        patches = patches.reshape(TA * W, 6 * Cin_p)
        acc = jnp.dot(patches, w_ref[ry],
                      preferred_element_type=jnp.float32)     # (TA*W, 2*Cout), f32
        y = jnp.maximum(acc + shift_ref[...], 0.0)            # bias+BN folded, ReLU
        o_ref[:, ry, :, :] = y.reshape(TA, W, 2 * Cout).astype(o_ref.dtype)


def up_conv_forward(x_nchw, w, b, gamma, beta, run_mean, run_var, eps=1e-5,
                    row_tile=None, compute_dtype=jnp.bfloat16):
    """x_nchw: (N, Cin, H, W); w: (Cout, Cin, 3, 3); returns (N, Cout, 2H, 2W)."""
    N, Cin, H, W = x_nchw.shape
    Cout = w.shape[0]
    H2, W2 = 2 * H, 2 * W
    Cin_p = _round_up(Cin, 8)

    TA = (_pick_row_tile(H, W, Cin_p, Cout) if row_tile is None
          else _largest_divisor_leq(H, row_tile))
    J = H // TA

    # ---- fold conv bias + BatchNorm(eval) into per-channel scale / shift ----
    scale = gamma * jax.lax.rsqrt(run_var + eps)              # (Cout,)
    shift = beta + (b - run_mean) * scale                     # (Cout,)

    # ---- fold the 2x nearest upsample into the 3x3 taps (subpixel weights) ----
    # R[ry, i, dy]: which conv row-taps dy land on original row offset i for parity ry.
    R = np.zeros((2, 2, 3), np.float32)
    R[0, 0, 0] = 1; R[0, 1, 1] = 1; R[0, 1, 2] = 1
    R[1, 0, 0] = 1; R[1, 0, 1] = 1; R[1, 1, 2] = 1
    # C[cx, q, dx]: which conv col-taps dx land on original col offset q for parity cx.
    C = np.zeros((2, 3, 3), np.float32)
    C[0, 0, 0] = 1; C[0, 1, 1] = 1; C[0, 1, 2] = 1
    C[1, 1, 0] = 1; C[1, 1, 1] = 1; C[1, 2, 2] = 1
    # wmix[ry, i, q, ci, cx, co] = sum_{dy,dx} R*C*w * scale[co]
    wmix = jnp.einsum('aiy,cqx,okyx,o->aiqkco', R, C, w.astype(jnp.float32), scale)
    wmix = jnp.pad(wmix, ((0, 0), (0, 0), (0, 0), (0, Cin_p - Cin), (0, 0), (0, 0)))
    wmix = wmix.reshape(2, 6 * Cin_p, 2 * Cout).astype(compute_dtype)
    shift2 = jnp.tile(shift, 2).reshape(1, 2 * Cout).astype(jnp.float32)

    # ---- input: NHWC, pad H/W by 1 (conv halo) and Cin to the 8-granule, cast ----
    x_nhwc = jnp.transpose(x_nchw, (0, 2, 3, 1))
    xp = jnp.pad(x_nhwc, ((0, 0), (1, 1), (1, 1), (0, Cin_p - Cin)))
    xp = xp.astype(compute_dtype)

    kernel = functools.partial(_up_conv_kernel, TA=TA, W=W, Cin_p=Cin_p, Cout=Cout)

    bpe = jnp.dtype(compute_dtype).itemsize
    vmem_est = (2 * (H + 2) * (W + 2) * Cin_p * bpe          # resident input (dbl buf)
                + 2 * 6 * Cin_p * 2 * Cout * bpe             # premixed weights
                + 2 * TA * 2 * W * 2 * Cout * 4              # output tile (dbl buf)
                + 4 * TA * W * 6 * Cin_p * bpe               # im2col slab + copies
                + 2 * TA * W * 2 * Cout * 4)                 # f32 accumulator
    vmem_limit = int(min(64 * 2 ** 20, max(32 * 2 ** 20, 2 * vmem_est)))

    out4 = pl.pallas_call(
        kernel,
        out_shape=jax.ShapeDtypeStruct((N * H, 2, W, 2 * Cout), x_nchw.dtype),
        grid_spec=pltpu.PrefetchScalarGridSpec(
            num_scalar_prefetch=0,
            grid=(N, J),
            in_specs=[
                pl.BlockSpec((1, H + 2, W + 2, Cin_p), lambda n, j: (n, 0, 0, 0)),
                pl.BlockSpec((2, 6 * Cin_p, 2 * Cout), lambda n, j: (0, 0, 0)),
                pl.BlockSpec((1, 2 * Cout), lambda n, j: (0, 0)),
            ],
            out_specs=pl.BlockSpec((TA, 2, W, 2 * Cout),
                                   lambda n, j: (n * J + j, 0, 0, 0)),
        ),
        compiler_params=pltpu.CompilerParams(
            dimension_semantics=("parallel", "parallel"),
            vmem_limit_bytes=vmem_limit),
    )(xp, wmix, shift2)

    # (N*H, 2, W, 2*Cout) is row-major-identical to NHWC (N, 2H, 2W, Cout): free reshape.
    out_nhwc = out4.reshape(N, H2, W2, Cout)
    # TODO(synk): a NHWC-consuming network could skip this transpose (one extra HBM pass);
    #             kept to match the PyTorch NCHW interface.
    return jnp.transpose(out_nhwc, (0, 3, 1, 2))


def _up_conv_reference(x, w, b, gamma, beta, mean, var, eps=1e-5):
    xu = jnp.repeat(jnp.repeat(x, 2, axis=2), 2, axis=3)     # nn.Upsample(scale=2)
    y = jax.lax.conv_general_dilated(
        xu, w, window_strides=(1, 1), padding=((1, 1), (1, 1)),
        dimension_numbers=('NCHW', 'OIHW', 'NCHW'))
    y = y + b[None, :, None, None]
    y = ((y - mean[None, :, None, None]) * (gamma * jax.lax.rsqrt(var + eps))[None, :, None, None]
         + beta[None, :, None, None])
    return jnp.maximum(y, 0.0)


if __name__ == "__main__":
    in_ch, out_ch = 4, 8
    N, H, W = 2, 16, 16

    key = jax.random.PRNGKey(0)
    kx, kw, kb, kg, kbe, km, kv = jax.random.split(key, 7)

    x = jax.random.normal(kx, (N, in_ch, H, W), dtype=jnp.float32)
    # Conv2d(in_ch, out_ch, kernel_size=3, padding=1, bias=True) parameters
    w = jax.random.normal(kw, (out_ch, in_ch, 3, 3), dtype=jnp.float32) * 0.1
    b = jax.random.normal(kb, (out_ch,), dtype=jnp.float32) * 0.1
    # BatchNorm2d(out_ch) parameters (deterministic synthetic init)
    gamma = 1.0 + 0.1 * jax.random.normal(kg, (out_ch,), dtype=jnp.float32)
    beta = 0.1 * jax.random.normal(kbe, (out_ch,), dtype=jnp.float32)
    run_mean = 0.1 * jax.random.normal(km, (out_ch,), dtype=jnp.float32)
    run_var = jnp.abs(1.0 + 0.1 * jax.random.normal(kv, (out_ch,), dtype=jnp.float32))

    out = up_conv_forward(x, w, b, gamma, beta, run_mean, run_var, row_tile=8)
    out = jax.block_until_ready(out)
    assert out.shape == (N, out_ch, 2 * H, 2 * W), out.shape

    ref = _up_conv_reference(x, w, b, gamma, beta, run_mean, run_var)
    err = float(jnp.max(jnp.abs(out - ref)))
    assert err < 1e-1, f"max abs err {err}"   # bf16-matmul tolerance
    print("KERNEL_OK")
</pallas_src>

<mosaic_0001>
module attributes {stable_mosaic.version = 11 : i64} {
  func.func @_up_conv_kernel(%arg0: i32, %arg1: i32, %arg2: memref<1x18x18x8xbf16, #tpu.memory_space<vmem>>, %arg3: memref<2x48x16xbf16, #tpu.memory_space<vmem>>, %arg4: memref<1x16xf32, #tpu.memory_space<vmem>>, %arg5: memref<8x2x16x16xf32, #tpu.memory_space<vmem>>) attributes {dimension_semantics = [#tpu.dimension_semantics<parallel>, #tpu.dimension_semantics<parallel>], iteration_bounds = array<i64: 2, 2>, scalar_prefetch = 0 : i64, scratch_operands = 0 : i64, tpu.core_type = #tpu.core_type<tc>, window_params = [{transform_indices = @transform_0, window_bounds = array<i64: 1, 18, 18, 8>}, {pipeline_mode = #tpu.pipeline_mode<synchronous>, transform_indices = @transform_1, window_bounds = array<i64: 2, 48, 16>}, {pipeline_mode = #tpu.pipeline_mode<synchronous>, transform_indices = @transform_2, window_bounds = array<i64: 1, 16>}, {transform_indices = @transform_3, window_bounds = array<i64: 8, 2, 16, 16>}]} {
    %c8_i32 = arith.constant 8 : i32
    %0 = arith.muli %arg1, %c8_i32 : i32
    %c0 = arith.constant 0 : index
    %1 = arith.index_cast %0 : i32 to index
    %c0_0 = arith.constant 0 : index
    %c0_1 = arith.constant 0 : index
    %2 = vector.load %arg2[%c0, %1, %c0_0, %c0_1] : memref<1x18x18x8xbf16, #tpu.memory_space<vmem>>, vector<1x10x18x8xbf16>
    %3 = vector.shape_cast %2 : vector<1x10x18x8xbf16> to vector<10x18x8xbf16>
    %4 = vector.extract_strided_slice %3 {offsets = [0, 0, 0], sizes = [8, 16, 8], strides = [1, 1, 1]} : vector<10x18x8xbf16> to vector<8x16x8xbf16>
    %5 = vector.extract_strided_slice %3 {offsets = [0, 1, 0], sizes = [8, 16, 8], strides = [1, 1, 1]} : vector<10x18x8xbf16> to vector<8x16x8xbf16>
    %6 = vector.extract_strided_slice %3 {offsets = [0, 2, 0], sizes = [8, 16, 8], strides = [1, 1, 1]} : vector<10x18x8xbf16> to vector<8x16x8xbf16>
    %7 = vector.extract_strided_slice %3 {offsets = [1, 0, 0], sizes = [8, 16, 8], strides = [1, 1, 1]} : vector<10x18x8xbf16> to vector<8x16x8xbf16>
    %8 = vector.extract_strided_slice %3 {offsets = [1, 1, 0], sizes = [8, 16, 8], strides = [1, 1, 1]} : vector<10x18x8xbf16> to vector<8x16x8xbf16>
    %9 = vector.extract_strided_slice %3 {offsets = [1, 2, 0], sizes = [8, 16, 8], strides = [1, 1, 1]} : vector<10x18x8xbf16> to vector<8x16x8xbf16>
    %10 = tpu.concatenate %4, %5, %6, %7, %8, %9 in 2 : vector<8x16x8xbf16>, vector<8x16x8xbf16>, vector<8x16x8xbf16>, vector<8x16x8xbf16>, vector<8x16x8xbf16>, vector<8x16x8xbf16> -> vector<8x16x48xbf16>
    %11 = vector.shape_cast %10 : vector<8x16x48xbf16> to vector<128x48xbf16>
    %c0_2 = arith.constant 0 : index
    %c0_3 = arith.constant 0 : index
    %c0_4 = arith.constant 0 : index
    %12 = vector.load %arg3[%c0_2, %c0_3, %c0_4] : memref<2x48x16xbf16, #tpu.memory_space<vmem>>, vector<1x48x16xbf16>
    %13 = vector.shape_cast %12 : vector<1x48x16xbf16> to vector<48x16xbf16>
    %cst = arith.constant dense<0.000000e+00> : vector<128x16xf32>
    %14 = tpu.matmul %11, %13, %cst {dimension_numbers = #tpu.dot_dimension_numbers<[1], [0], [0], [1], [0, 0, 1, 1], [], []>} : vector<128x48xbf16>, vector<48x16xbf16>, vector<128x16xf32> -> vector<128x16xf32>
    %c0_5 = arith.constant 0 : index
    %c0_6 = arith.constant 0 : index
    %15 = vector.load %arg4[%c0_5, %c0_6] : memref<1x16xf32, #tpu.memory_space<vmem>>, vector<1x16xf32>
    %16 = vector.broadcast %15 : vector<1x16xf32> to vector<128x16xf32>
    %17 = arith.addf %14, %16 : vector<128x16xf32>
    %cst_7 = arith.constant 0.000000e+00 : f32
    %18 = vector.broadcast %cst_7 : f32 to vector<128x16xf32>
    %19 = arith.maximumf %17, %18 : vector<128x16xf32>
    %20 = vector.shape_cast %19 : vector<128x16xf32> to vector<8x16x16xf32>
    %c0_8 = arith.constant 0 : index
    %c0_9 = arith.constant 0 : index
    %c0_10 = arith.constant 0 : index
    %c0_11 = arith.constant 0 : index
    %21 = vector.load %arg5[%c0_8, %c0_9, %c0_10, %c0_11] : memref<8x2x16x16xf32, #tpu.memory_space<vmem>>, vector<8x1x16x16xf32>
    %22 = vector.shape_cast %21 : vector<8x1x16x16xf32> to vector<8x16x16xf32>
    %23 = vector.shape_cast %20 : vector<8x16x16xf32> to vector<8x1x16x16xf32>
    tpu.vector_store %arg5[%c0_8, %c0_9, %c0_10, %c0_11], %23 {strides = array<i32>} : memref<8x2x16x16xf32, #tpu.memory_space<vmem>>, vector<8x1x16x16xf32>,
    %24 = vector.extract_strided_slice %3 {offsets = [1, 0, 0], sizes = [8, 16, 8], strides = [1, 1, 1]} : vector<10x18x8xbf16> to vector<8x16x8xbf16>
    %25 = vector.extract_strided_slice %3 {offsets = [1, 1, 0], sizes = [8, 16, 8], strides = [1, 1, 1]} : vector<10x18x8xbf16> to vector<8x16x8xbf16>
    %26 = vector.extract_strided_slice %3 {offsets = [1, 2, 0], sizes = [8, 16, 8], strides = [1, 1, 1]} : vector<10x18x8xbf16> to vector<8x16x8xbf16>
    %27 = vector.extract_strided_slice %3 {offsets = [2, 0, 0], sizes = [8, 16, 8], strides = [1, 1, 1]} : vector<10x18x8xbf16> to vector<8x16x8xbf16>
    %28 = vector.extract_strided_slice %3 {offsets = [2, 1, 0], sizes = [8, 16, 8], strides = [1, 1, 1]} : vector<10x18x8xbf16> to vector<8x16x8xbf16>
    %29 = vector.extract_strided_slice %3 {offsets = [2, 2, 0], sizes = [8, 16, 8], strides = [1, 1, 1]} : vector<10x18x8xbf16> to vector<8x16x8xbf16>
    %30 = tpu.concatenate %24, %25, %26, %27, %28, %29 in 2 : vector<8x16x8xbf16>, vector<8x16x8xbf16>, vector<8x16x8xbf16>, vector<8x16x8xbf16>, vector<8x16x8xbf16>, vector<8x16x8xbf16> -> vector<8x16x48xbf16>
    %31 = vector.shape_cast %30 : vector<8x16x48xbf16> to vector<128x48xbf16>
    %c1 = arith.constant 1 : index
    %c0_12 = arith.constant 0 : index
    %c0_13 = arith.constant 0 : index
    %32 = vector.load %arg3[%c1, %c0_12, %c0_13] : memref<2x48x16xbf16, #tpu.memory_space<vmem>>, vector<1x48x16xbf16>
    %33 = vector.shape_cast %32 : vector<1x48x16xbf16> to vector<48x16xbf16>
    %cst_14 = arith.constant dense<0.000000e+00> : vector<128x16xf32>
    %34 = tpu.matmul %31, %33, %cst_14 {dimension_numbers = #tpu.dot_dimension_numbers<[1], [0], [0], [1], [0, 0, 1, 1], [], []>} : vector<128x48xbf16>, vector<48x16xbf16>, vector<128x16xf32> -> vector<128x16xf32>
    %c0_15 = arith.constant 0 : index
    %c0_16 = arith.constant 0 : index
    %35 = vector.load %arg4[%c0_15, %c0_16] : memref<1x16xf32, #tpu.memory_space<vmem>>, vector<1x16xf32>
    %36 = vector.broadcast %35 : vector<1x16xf32> to vector<128x16xf32>
    %37 = arith.addf %34, %36 : vector<128x16xf32>
    %cst_17 = arith.constant 0.000000e+00 : f32
    %38 = vector.broadcast %cst_17 : f32 to vector<128x16xf32>
    %39 = arith.maximumf %37, %38 : vector<128x16xf32>
    %40 = vector.shape_cast %39 : vector<128x16xf32> to vector<8x16x16xf32>
    %c0_18 = arith.constant 0 : index
    %c1_19 = arith.constant 1 : index
    %c0_20 = arith.constant 0 : index
    %c0_21 = arith.constant 0 : index
    %41 = vector.load %arg5[%c0_18, %c1_19, %c0_20, %c0_21] : memref<8x2x16x16xf32, #tpu.memory_space<vmem>>, vector<8x1x16x16xf32>
    %42 = vector.shape_cast %41 : vector<8x1x16x16xf32> to vector<8x16x16xf32>
    %43 = vector.shape_cast %40 : vector<8x16x16xf32> to vector<8x1x16x16xf32>
    tpu.vector_store %arg5[%c0_18, %c1_19, %c0_20, %c0_21], %43 {strides = array<i32>} : memref<8x2x16x16xf32, #tpu.memory_space<vmem>>, vector<8x1x16x16xf32>,
    return
  }
  func.func @transform_0(%arg0: i32, %arg1: i32) -> (i32, i32, i32, i32) {
    %c0_i32 = arith.constant 0 : i32
    %c0_i32_0 = arith.constant 0 : i32
    %c0_i32_1 = arith.constant 0 : i32
    %c0_i32_2 = arith.constant 0 : i32
    return %arg0, %c0_i32, %c0_i32_0, %c0_i32_1 : i32, i32, i32, i32
  }
  func.func @transform_1(%arg0: i32, %arg1: i32) -> (i32, i32, i32) {
    %c0_i32 = arith.constant 0 : i32
    %c0_i32_0 = arith.constant 0 : i32
    %c0_i32_1 = arith.constant 0 : i32
    %c0_i32_2 = arith.constant 0 : i32
    return %c0_i32, %c0_i32_0, %c0_i32_1 : i32, i32, i32
  }
  func.func @transform_2(%arg0: i32, %arg1: i32) -> (i32, i32) {
    %c0_i32 = arith.constant 0 : i32
    %c0_i32_0 = arith.constant 0 : i32
    %c0_i32_1 = arith.constant 0 : i32
    return %c0_i32, %c0_i32_0 : i32, i32
  }
  func.func @transform_3(%arg0: i32, %arg1: i32) -> (i32, i32, i32, i32) {
    %c2_i32 = arith.constant 2 : i32
    %0 = arith.muli %arg0, %c2_i32 : i32
    %1 = arith.addi %0, %arg1 : i32
    %c0_i32 = arith.constant 0 : i32
    %c0_i32_0 = arith.constant 0 : i32
    %c0_i32_1 = arith.constant 0 : i32
    %c0_i32_2 = arith.constant 0 : i32
    return %1, %c0_i32, %c0_i32_0, %c0_i32_1 : i32, i32, i32, i32
  }
}

</mosaic_0001>

<bundles_post_ra>
// kernel: tpu_custom_call.1
= control target key start
LH: loop header
LB: loop body
LE: loop exit
PB: predicated region body
PF: predicated region fallthrough
CT: control target
= control target key end

     0   :  { %s1355_s12 = smov 0   ;;  %s1357_s13 = smov 0   ;;  %s1770_s0 = inlined_call_operand.vmem [shape: bf16[2,18,18,8], index: 0, kind: input, shape index: {}]   ;;  %s1771_s1 = inlined_call_operand.vmem [shape: bf16[2,48,16], index: 1, kind: input, shape index: {}]   ;;  %s1772_s2 = inlined_call_operand.vmem [shape: f32[1,16], index: 2, kind: input, shape index: {}]   ;;  %s1773_s3 = inlined_call_operand.vmem [shape: f32[32,2,16,16], index: 3, kind: output, shape index: {}]  }
   0x1   :  { %s1359_s14 = smov 0   ;;  %s1361_s15 = smov 0  }
   0x2   :  { %s1363_s16 = smov 0  }
   0x3 LB: > { %s22_s17 = sadd.s32 1, %s1320_s14  ;;  %s25_s18 = sadd.s32 1, %s1324_s15  ;;  %s1328_s16 = sphi %s1363_s16, %s13_s16   ;;  %s1324_s15 = sphi %s1361_s15, %s1777_s15   ;;  %s1320_s14 = sphi %s1359_s14, %s1776_s14   ;;  %s1316_s13 = sphi %s1357_s13, %s1775_s13   ;;  %s1312_s12 = sphi %s1355_s12, %s1774_s12  }
   0x4   : > { %p23_p0 = scmp.ge.s32.totalorder %s22_s17, 2  ;;  %p1073_p1 = scmp.ge.s32.totalorder %s1328_s16, 1 }
   0x5   : > { %p153_p2 = scmp.lt.s32.totalorder %s1328_s16, 5 }
   0x6   : > { %s1779_s17 = smov (%p23_p0, %s22_s17), 0  ;;  %s1781_s18 = smov (!%p23_p0, %s25_s18), %s1324_s15 }
   0x7   : > { %p154_p3 = pnand %p1073_p1, %p153_p2  ;;  %p27_p4 = scmp.ge.s32.totalorder %s1781_s18, 2 }
   0x8   : > { %p180_p5 = scmp.lt.s32.totalorder (!%p154_p3), %s1316_s13, 1  ;;  %s1151_s20 = smul.u32 (!%p154_p3), 96, %s1312_s12  ;;  %vm408_vm0 = vcmask (!%p154_p3), 1046528   ;;  %vm295_vm1 = vsmask.f32 (!%p154_p3), 7424  ;;  %v1284_v47 = vld [vmem:[%s1771_s1] sm:$0xff] (!%p154_p3)  }
   0x9   : > { %s1783_s18 = smov (%p27_p4, %s1781_s18), 0  ;;  %157 = sbr.rel (%p154_p3) target bundleno = 447 (0x1bf), region = 32 }
   0xa   : > { %s1330_s26 = smov (!%p154_p3), 24   ;;  %s1331_s27 = smov (!%p154_p3), 16   ;;  %1174 = vmatprep.subr.bf16.mxu0 (!%p154_p3), %v1284_v47  ;;  %v1285_v59 = vld [vmem:[%s1771_s1 + $0x18] sm:$0xff] (!%p154_p3)   ;;  %vm520_vm2 = vcmask (!%p154_p3), 64512   ;;  %vm537_vm3 = vcmask (!%p154_p3), 130048   ;;  %vm554_vm4 = vcmask (!%p154_p3), 195584  }
   0xb   : > { %s1332_s28 = smov (!%p154_p3), 8   ;;  %s1333_s4 = smov (!%p154_p3), 32   ;;  %1175 = vmatpush3.bf16.msra.mxu0 (!%p154_p3), %v1284_v47  ;;  %1196 = vmatprep.subr.bf16.mxu1 (!%p154_p3), %v1285_v59  ;;  %vm571_vm5 = vcmask (!%p154_p3), 261120   ;;  %vm588_vm6 = vcmask (!%p154_p3), 326656   ;;  %vm636_vm7 = vcmask (!%p154_p3), 392192  }
   0xc   : > { %s1334_s7 = smov (!%p154_p3), 40   ;;  %1197 = vmatpush3.bf16.msra.mxu1 (!%p154_p3), %v1285_v59  ;;  %s1075_s23 = sshll.u32 (!%p154_p3), %s1316_s13, 1 }
  0x10   : > { %s181_s19 = scalar_select %p180_p5, %s1316_s13, 1 }
  0x12   : > { %s1218_s21 = smul.u32 216, %s181_s19 }
  0x14   : > { %s184_s24 = scalar_lea.vmem %s1770_s0, %s1218_s21 }
  0x15   : > { %s1395_s25 = scalar_lea.vmem %s184_s24, %s1151_s20  ;;  %s186_s24 = sadd.s32 %s1312_s12, %s1075_s23 }
  0x16   : > { %v1398_v0 = vld [vmem:[%s1395_s25 + $0x18] sm:$0xff]   ;;  %v1401_v1 = vld [vmem:[%s1395_s25 + $0xc] sm:$0xff]   ;;  %v1406_v2 = vld [vmem:[%s1395_s25 + $0x24] sm:$0xff]  }
  0x17   : > { %456 = vrot.lane.b32.xlu1 %v1398_v0, %s1330_s26  ;;  %v415_v3 = vrot.slane %v1398_v0, 1  ;;  %454 = vrot.lane.b32.xlu0 %v1401_v1, %s1330_s26  ;;  %v1412_v4 = vld [vmem:[%s1395_s25] sm:$0xff]   ;;  %v1268_v5 = vld [vmem:[%s1395_s25 + $0x8] ss:$0 sps:$4 sm:$0x11]   ;;  %v412_v7 = vrot.slane %v1401_v1, 1 }
  0x18   : > { %v1269_v6 = vld [vmem:[%s1395_s25 + $0x14] ss:$0 sps:$4 sm:$0x11]   ;;  %v409_v8 = vrot.slane %v1412_v4, 1  ;;  %v410_v9 = vrot.slane %v1268_v5, 1  ;;  %v321_v11 = vshrl.u32 %v1398_v0, 16 }
  0x19   : > { %v1270_v10 = vld [vmem:[%s1395_s25 + $0x20] ss:$0 sps:$4 sm:$0x11]   ;;  %v413_v12 = vrot.slane %v1269_v6, 1  ;;  %v323_v13 = vshll.u32 %v1398_v0, 16  ;;  %v297_v14 = vshrl.u32 %v1412_v4, 16 }
  0x1a   : > { %v299_v15 = vshll.u32 %v1412_v4, 16  ;;  %v411_v16 = vsel %vm408_vm0, %v409_v8, %v410_v9  ;;  %v416_v17 = vrot.slane %v1270_v10, 1  ;;  %v328_v18 = vshll.u32 %v1270_v10, 16  ;;  %v1271_v20 = vld [vmem:[%s1395_s25 + $0x2c] ss:$0 sps:$4 sm:$0x11]  }
  0x1b   : > { %458 = vrot.lane.b32.xlu0 %v1406_v2, %s1330_s26  ;;  %v304_v19 = vshll.u32 %v1268_v5, 16  ;;  %433 = vrot.lane.b32.xlu1 %v411_v16, %s1331_s27  ;;  %v414_v21 = vsel %vm408_vm0, %v412_v7, %v413_v12  ;;  %v325_v22 = vrot.slane %v323_v13, 1  ;;  %v309_v24 = vshrl.u32 %v1401_v1, 16  ;;  %v1441_v42 = vld [vmem:[%s1395_s25 + $0x30] sm:$0xff]   ;;  %v1455_v49 = vld [vmem:[%s1395_s25 + $0x60] sm:$0xff]  }
  0x1c   : > { %v301_v23 = vrot.slane %v299_v15, 1  ;;  %v417_v25 = vsel %vm408_vm0, %v415_v3, %v416_v17  ;;  %v330_v26 = vrot.slane %v328_v18, 1  ;;  %v311_v28 = vshll.u32 %v1401_v1, 16  ;;  %v1446_v45 = vld [vmem:[%s1395_s25 + $0x38] ss:$0 sps:$4 sm:$0x11]  }
  0x1d   : > { %v306_v27 = vrot.slane %v304_v19, 1  ;;  %v326_v29 = vor.u32 %v325_v22, %v321_v11  ;;  %v316_v31 = vshll.u32 %v1269_v6, 16  ;;  %v335_v33 = vshll.u32 %v1406_v2, 16  ;;  %v1460_v51 = vld [vmem:[%s1395_s25 + $0x6c] sm:$0xff]   ;;  %v1470_v58 = vld [vmem:[%s1395_s25 + $0x3c] sm:$0xff]  }
  0x1e   : > { %v302_v30 = vor.u32 %v301_v23, %v297_v14  ;;  %v313_v32 = vrot.slane %v311_v28, 1  ;;  %v333_v36 = vshrl.u32 %v1406_v2, 16  ;;  %v340_v40 = vshll.u32 %v1271_v20, 16  ;;  %v1466_v56 = vld [vmem:[%s1395_s25 + $0x68] ss:$0 sps:$4 sm:$0x11]  }
  0x1f   : > { %435 = vrot.lane.b32.xlu0 %v414_v21, %s1331_s27  ;;  %437 = vrot.lane.b32.xlu1 %v417_v25, %s1331_s27  ;;  %v318_v35 = vrot.slane %v316_v31, 1  ;;  %v331_v37 = vsel %vm295_vm1, %v326_v29, %v330_v26  ;;  %v337_v39 = vrot.slane %v335_v33, 1  ;;  %v347_v46 = vshll.u32 %v1441_v42, 16  ;;  %v1283_v61 = vld [vmem:[%s1395_s25 + $0x74] ss:$0 sps:$4 sm:$0x11]  }
  0x20   : > { %v307_v34 = vsel %vm295_vm1, %v302_v30, %v306_v27  ;;  %v314_v38 = vor.u32 %v313_v32, %v309_v24  ;;  %v342_v44 = vrot.slane %v340_v40, 1  ;;  %v418_v50 = vrot.slane %v1406_v2, 1  ;;  %v1286_v8 = vld [vmem:[%s1771_s1 + $0x8] sm:$0xff]   ;;  %v1287_v9 = vld [vmem:[%s1771_s1 + $0x20] sm:$0xff]   ;;  %v1288_v10 = vld [vmem:[%s1771_s1 + $0x10] sm:$0xff]  }
  0x21   : > { %v338_v43 = vor.u32 %v337_v39, %v333_v36  ;;  %v419_v52 = vrot.slane %v1271_v20, 1  ;;  %v345_v53 = vshrl.u32 %v1441_v42, 16  ;;  %v349_v54 = vrot.slane %v347_v46, 1  ;;  %1176 = vmatprep.subr.bf16.mxu0 %v1286_v8  ;;  %1198 = vmatprep.subr.bf16.mxu1 %v1287_v9  ;;  %v1289_v15 = vld [vmem:[%s1771_s1 + $0x28] sm:$0xff]  }
  0x22   : > { %v319_v41 = vsel %vm295_vm1, %v314_v38, %v318_v35  ;;  %v352_v55 = vshll.u32 %v1446_v45, 16  ;;  %v501_v57 = vrot.slane %v1455_v49, 1  ;;  %v502_v60 = vrot.slane %v1466_v56, 1  ;;  %1177 = vmatpush3.bf16.msra.mxu0 %v1286_v8  ;;  %1199 = vmatpush3.bf16.msra.mxu1 %v1287_v9  ;;  %v1515_v29 = vld [vmem:[%s1395_s25 + $0x48] sm:$0xff]  }
  0x23   : > { %392 = vrot.lane.b32.xlu0 %v307_v34, %s1332_s28  ;;  %396 = vrot.lane.b32.xlu1 %v331_v37, %s1332_s28  ;;  %v343_v48 = vsel %vm295_vm1, %v338_v43, %v342_v44  ;;  %v797_v62 = vshrl.u32 %v1460_v51, 16  ;;  %v799_v63 = vshll.u32 %v1460_v51, 16  ;;  %v420_v3 = vsel %vm408_vm0, %v418_v50, %v419_v52  ;;  %v1277_v32 = vld [vmem:[%s1395_s25 + $0x50] ss:$0 sps:$4 sm:$0x11]   ;;  %v1532_v44 = vld [vmem:[%s1395_s25 + $0x54] sm:$0xff]  }
  0x24   : > { %v350_v5 = vor.u32 %v349_v54, %v345_v53  ;;  %v354_v6 = vrot.slane %v352_v55, 1  ;;  %v810_v7 = vrot.slane %v1460_v51, 1  ;;  %v1493_v11 = vsel %vm408_vm0, %v501_v57, %v502_v60  ;;  %1178 = vmatprep.subr.bf16.mxu0 %v1288_v10  ;;  %1200 = vmatprep.subr.bf16.mxu1 %v1289_v15 }
  0x25   : > { %v801_v12 = vrot.slane %v799_v63, 1  ;;  %v804_v13 = vshll.u32 %v1283_v61, 16  ;;  %v811_v14 = vrot.slane %v1283_v61, 1  ;;  %v421_v16 = vrot.slane %v1441_v42, 1 }
  0x26   : > { %v355_v19 = vsel %vm295_vm1, %v350_v5, %v354_v6  ;;  %v422_v20 = vrot.slane %v1446_v45, 1  ;;  %v359_v22 = vshll.u32 %v1470_v58, 16  ;;  %1179 = vmatpush3.bf16.msra.mxu0 %v1288_v10  ;;  %v357_v26 = vshrl.u32 %v1470_v58, 16  ;;  %1201 = vmatpush3.bf16.msra.mxu1 %v1289_v15 }
  0x27   : > { %394 = vrot.lane.b32.xlu0 %v319_v41, %s1332_s28  ;;  %485 = vrot.lane.b32.xlu1 %v319_v41, %s1333_s4  ;;  %v802_v17 = vor.u32 %v801_v12, %v797_v62  ;;  %v806_v18 = vrot.slane %v804_v13, 1  ;;  %v1505_v23 = vsel %vm408_vm0, %v810_v7, %v811_v14  ;;  %v371_v33 = vshll.u32 %v1515_v29, 16 }
  0x28   : > { %v361_v27 = vrot.slane %v359_v22, 1  ;;  %v424_v34 = vrot.slane %v1470_v58, 1  ;;  %v376_v39 = vshll.u32 %v1277_v32, 16  ;;  %v427_v46 = vrot.slane %v1515_v29, 1 }
  0x29   : > { %v1509_v24 = vsel %vm295_vm1, %v802_v17, %v806_v18  ;;  %v373_v38 = vrot.slane %v371_v33, 1  ;;  %v428_v47 = vrot.slane %v1277_v32, 1  ;;  %v383_v50 = vshll.u32 %v1532_v44, 16 }
  0x2a   : > { %v362_v30 = vor.u32 %v361_v27, %v357_v26  ;;  %v378_v43 = vrot.slane %v376_v39, 1  ;;  %v381_v53 = vshrl.u32 %v1532_v44, 16  ;;  %v476_v60 = vshll.u32 %v1455_v49, 16 }
  0x2b   : > { %487 = vrot.lane.b32.xlu0 %v331_v37, %s1333_s4  ;;  %489 = vrot.lane.b32.xlu1 %v343_v48, %s1333_s4  ;;  %v369_v37 = vshrl.u32 %v1515_v29, 16  ;;  %v429_v52 = vsel %vm408_vm0, %v427_v46, %v428_v47  ;;  %v385_v54 = vrot.slane %v383_v50, 1  ;;  %v430_v62 = vrot.slane %v1532_v44, 1 }
  0x2c   : > { %v478_v5 = vrot.slane %v476_v60, 1  ;;  %v481_v6 = vshll.u32 %v1466_v56, 16 }
  0x2d   : > { %v374_v41 = vor.u32 %v373_v38, %v369_v37  ;;  %v386_v57 = vor.u32 %v385_v54, %v381_v53 }
  0x2e   : > { %v483_v9 = vrot.slane %v481_v6, 1 }
  0x2f   : > { %504 = vrot.lane.b32.xlu0 %v414_v21, %s1334_s7  ;;  %506 = vrot.lane.b32.xlu1 %v417_v25, %s1334_s7  ;;  %v1275_v21 = vld [vmem:[%s1395_s25 + $0x44] ss:$0 sps:$4 sm:$0x11]   ;;  %v423_v25 = vsel %vm408_vm0, %v421_v16, %v422_v20  ;;  %v379_v45 = vsel %vm295_vm1, %v374_v41, %v378_v43 }
  0x30   : > { %v364_v28 = vshll.u32 %v1275_v21, 16  ;;  %v425_v35 = vrot.slane %v1275_v21, 1 }
  0x32   : > { %v366_v31 = vrot.slane %v364_v28, 1  ;;  %v426_v40 = vsel %vm408_vm0, %v424_v34, %v425_v35 }
  0x33   : > { %508 = vrot.lane.b32.xlu0 %v420_v3, %s1334_s7  ;;  %398 = vrot.lane.b32.xlu1 %v343_v48, %s1332_s28  ;;  %v1279_v48 = vld [vmem:[%s1395_s25 + $0x5c] ss:$0 sps:$4 sm:$0x11]   ;;  %s1076_s25 = sshll.u32 %s186_s24, 3 }
  0x34   : > { %v367_v36 = vsel %vm295_vm1, %v362_v30, %v366_v31  ;;  %v388_v55 = vshll.u32 %v1279_v48, 16  ;;  %v431_v63 = vrot.slane %v1279_v48, 1  ;;  %p188_p6 = scmp.lt.s32.totalorder %s1076_s25, 31 }
  0x36   : > { %v390_v59 = vrot.slane %v388_v55, 1  ;;  %v432_v7 = vsel %vm408_vm0, %v430_v62, %v431_v63  ;;  %s1785_s25 = smov (!%p188_p6, %s1076_s25), 31 }
  0x37   : > { %400 = vrot.lane.b32.xlu0 %v355_v19, %s1332_s28  ;;  %439 = vrot.lane.b32.xlu1 %v420_v3, %s1331_s27  ;;  %v474_v3 = vshrl.u32 %v1455_v49, 16 }
  0x38   : > { %v391_v61 = vsel %vm295_vm1, %v386_v57, %v390_v59 }
  0x39   : > { %v479_v8 = vor.u32 %v478_v5, %v474_v3 }
  0x3b   : > { %441 = vrot.lane.b32.xlu0 %v423_v25, %s1331_s27  ;;  %460 = vrot.lane.b32.xlu1 %v1441_v42, %s1330_s26  ;;  %v484_v10 = vsel %vm295_vm1, %v479_v8, %v483_v9 }
  0x3f   : > { %462 = vrot.lane.b32.xlu0 %v1470_v58, %s1330_s26  ;;  %491 = vrot.lane.b32.xlu1 %v355_v19, %s1333_s4 }
  0x43   : > { %493 = vrot.lane.b32.xlu0 %v367_v36, %s1333_s4  ;;  %510 = vrot.lane.b32.xlu1 %v423_v25, %s1334_s7 }
  0x47   : > { %512 = vrot.lane.b32.xlu0 %v426_v40, %s1334_s7  ;;  %402 = vrot.lane.b32.xlu1 %v367_v36, %s1332_s28 }
  0x4b   : > { %404 = vrot.lane.b32.xlu0 %v379_v45, %s1332_s28  ;;  %443 = vrot.lane.b32.xlu1 %v426_v40, %s1331_s27 }
  0x4f   : > { %445 = vrot.lane.b32.xlu0 %v429_v52, %s1331_s27  ;;  %464 = vrot.lane.b32.xlu1 %v1515_v29, %s1330_s26 }
  0x53   : > { %466 = vrot.lane.b32.xlu0 %v1532_v44, %s1330_s26  ;;  %495 = vrot.lane.b32.xlu1 %v379_v45, %s1333_s4 }
  0x57   : > { %497 = vrot.lane.b32.xlu0 %v391_v61, %s1333_s4  ;;  %514 = vrot.lane.b32.xlu1 %v429_v52, %s1334_s7 }
  0x5b   : > { %516 = vrot.lane.b32.xlu0 %v432_v7, %s1334_s7  ;;  %406 = vrot.lane.b32.xlu1 %v391_v61, %s1332_s28 }
  0x5f   : > { %447 = vrot.lane.b32.xlu0 %v432_v7, %s1331_s27  ;;  %782 = vrot.lane.b32.xlu1 %v484_v10, %s1332_s28  ;;  %s1150_s28 = sshll.u32 %s1785_s25, 5 }
  0x63   : > { %468 = vrot.lane.b32.xlu0 %v1455_v49, %s1330_s26  ;;  %784 = vrot.lane.b32.xlu1 %v1493_v11, %s1331_s27 }
  0x67   : > { %499 = vrot.lane.b32.xlu0 %v484_v10, %s1333_s4  ;;  %791 = vrot.lane.b32.xlu1 %v1460_v51, %s1330_s26 }
  0x6b   : > { %518 = vrot.lane.b32.xlu0 %v1493_v11, %s1334_s7  ;;  %808 = vrot.lane.b32.xlu1 %v1509_v24, %s1333_s4  ;;  %s1658_s4 = scalar_lea.vmem %s1773_s3, %s1150_s28 }
  0x6f   : > { %813 = vrot.lane.b32.xlu0 %v1505_v23, %s1334_s7 }
  0x89   : > { %v457_v56 = vpop.permute.xlu1 %456  ;;  %v455_v12 = vpop.permute.xlu0 %454 }
  0x8d   : > { %v459_v13 = vpop.permute.xlu0 %458  ;;  %v434_v14 = vpop.permute.xlu1 %433 }
  0x91   : > { %v436_v15 = vpop.permute.xlu0 %435  ;;  %v438_v16 = vpop.permute.xlu1 %437 }
  0x95   : > { %v393_v17 = vpop.permute.xlu0 %392  ;;  %v397_v18 = vpop.permute.xlu1 %396 }
  0x96   : > { %v522_v51 = vsel %vm520_vm2, %v1412_v4, %v393_v17  ;;  %v526_v24 = vsel %vm520_vm2, %v1398_v0, %v397_v18 }
  0x97   : > { %v539_v20 = vsel %vm537_vm3, %v522_v51, %v434_v14 }
  0x98   : > { %v556_v25 = vsel %vm554_vm4, %v539_v20, %v455_v12 }
  0x99   : > { %v395_v11 = vpop.permute.xlu0 %394  ;;  %v486_v21 = vpop.permute.xlu1 %485 }
  0x9a   : > { %v524_v19 = vsel %vm520_vm2, %v1401_v1, %v395_v11  ;;  %v543_v1 = vsel %vm537_vm3, %v526_v24, %v438_v16  ;;  %v573_v27 = vsel %vm571_vm5, %v556_v25, %v486_v21 }
  0x9b   : > { %v541_v22 = vsel %vm537_vm3, %v524_v19, %v436_v15  ;;  %v560_v0 = vsel %vm554_vm4, %v543_v1, %v459_v13 }
  0x9c   : > { %v558_v4 = vsel %vm554_vm4, %v541_v22, %v457_v56 }
  0x9d   : > { %v488_v23 = vpop.permute.xlu0 %487  ;;  %v490_v26 = vpop.permute.xlu1 %489 }
  0x9e   : > { %v575_v31 = vsel %vm571_vm5, %v558_v4, %v488_v23  ;;  %v577_v34 = vsel %vm571_vm5, %v560_v0, %v490_v26 }
  0xa1   : > { %v505_v28 = vpop.permute.xlu0 %504  ;;  %v507_v32 = vpop.permute.xlu1 %506 }
  0xa2   : > { %v590_v30 = vsel %vm588_vm6, %v573_v27, %v505_v28  ;;  %v592_v33 = vsel %vm588_vm6, %v575_v31, %v507_v32 }
  0xa3   : > { %1180 = vmatprep.mubr.msk.bf16.mxu0 %vm636_vm7, %v590_v30  ;;  %1202 = vmatprep.mubr.msk.bf16.mxu1 %vm636_vm7, %v592_v33 }
  0xa4   : > { %1181 = vmatmul.mubr.msk.bf16.vlgmr.msra.gmra.mrb[0].mxu0 %vm636_vm7, %v592_v33  ;;  %v1652_v33 = vld [vmem:[%s1772_s2] ss:$0 sm:$0xff] }
  0xa5   : > { %v509_v35 = vpop.permute.xlu0 %508  ;;  %v399_v37 = vpop.permute.xlu1 %398 }
  0xa6   : > { %v594_v36 = vsel %vm588_vm6, %v577_v34, %v509_v35  ;;  %v528_v45 = vsel %vm520_vm2, %v1406_v2, %v399_v37 }
  0xa7   : > { %1184 = vmatprep.mubr.msk.bf16.mxu0 %vm636_vm7, %v594_v36  ;;  %1203 = vmatmul.mubr.msk.bf16.vlgmr.msra.gmra.mrb[0].mxu1 %vm636_vm7, %v594_v36 }
  0xa9   : > { %v401_v38 = vpop.permute.xlu0 %400  ;;  %v440_v39 = vpop.permute.xlu1 %439 }
  0xaa   : > { %v545_v47 = vsel %vm537_vm3, %v528_v45, %v440_v39  ;;  %v530_v50 = vsel %vm520_vm2, %v1441_v42, %v401_v38 }
  0xad   : > { %v442_v40 = vpop.permute.xlu0 %441  ;;  %v461_v41 = vpop.permute.xlu1 %460 }
  0xae   : > { %v562_v52 = vsel %vm554_vm4, %v545_v47, %v461_v41  ;;  %v547_v53 = vsel %vm537_vm3, %v530_v50, %v442_v40 }
  0xb1   : > { %v463_v43 = vpop.permute.xlu0 %462  ;;  %v492_v46 = vpop.permute.xlu1 %491 }
  0xb2   : > { %v579_v54 = vsel %vm571_vm5, %v562_v52, %v492_v46  ;;  %v564_v57 = vsel %vm554_vm4, %v547_v53, %v463_v43 }
  0xb5   : > { %v494_v48 = vpop.permute.xlu0 %493  ;;  %v511_v55 = vpop.permute.xlu1 %510 }
  0xb6   : > { %v596_v59 = vsel %vm588_vm6, %v579_v54, %v511_v55  ;;  %v581_v2 = vsel %vm571_vm5, %v564_v57, %v494_v48 }
  0xb7   : > { %1185 = vmatmul.mubr.msk.bf16.gmra.mrb[4].mxu0 %vm636_vm7, %v596_v59  ;;  %1206 = vmatprep.mubr.msk.bf16.mxu1 %vm636_vm7, %v596_v59 }
  0xb9   : > { %v513_v60 = vpop.permute.xlu0 %512  ;;  %v403_v61 = vpop.permute.xlu1 %402 }
  0xba   : > { %v598_v42 = vsel %vm588_vm6, %v581_v2, %v513_v60  ;;  %v532_v7 = vsel %vm520_vm2, %v1470_v58, %v403_v61 }
  0xbb   : > { %1188 = vmatprep.mubr.msk.bf16.mxu0 %vm636_vm7, %v598_v42  ;;  %1207 = vmatmul.mubr.msk.bf16.gmra.mrb[4].mxu1 %vm636_vm7, %v598_v42 }
  0xbd   : > { %v405_v62 = vpop.permute.xlu0 %404  ;;  %v444_v63 = vpop.permute.xlu1 %443 }
  0xbe   : > { %v549_v9 = vsel %vm537_vm3, %v532_v7, %v444_v63  ;;  %v534_v56 = vsel %vm520_vm2, %v1515_v29, %v405_v62 }
  0xc1   : > { %v446_v3 = vpop.permute.xlu0 %445  ;;  %v465_v5 = vpop.permute.xlu1 %464 }
  0xc2   : > { %v566_v12 = vsel %vm554_vm4, %v549_v9, %v465_v5  ;;  %v551_v13 = vsel %vm537_vm3, %v534_v56, %v446_v3 }
  0xc5   : > { %v467_v6 = vpop.permute.xlu0 %466  ;;  %v496_v8 = vpop.permute.xlu1 %495 }
  0xc6   : > { %v583_v14 = vsel %vm571_vm5, %v566_v12, %v496_v8  ;;  %v568_v16 = vsel %vm554_vm4, %v551_v13, %v467_v6 }
  0xc9   : > { %v498_v10 = vpop.permute.xlu0 %497  ;;  %v515_v15 = vpop.permute.xlu1 %514 }
  0xca   : > { %v600_v17 = vsel %vm588_vm6, %v583_v14, %v515_v15  ;;  %v585_v58 = vsel %vm571_vm5, %v568_v16, %v498_v10 }
  0xcb   : > { %1189 = vmatmul.mubr.msk.bf16.gmra.mrb[8].mxu0 %vm636_vm7, %v600_v17  ;;  %1210 = vmatprep.mubr.msk.bf16.mxu1 %vm636_vm7, %v600_v17 }
  0xcd   : > { %v517_v18 = vpop.permute.xlu0 %516  ;;  %v407_v51 = vpop.permute.xlu1 %406 }
  0xce   : > { %v602_v29 = vsel %vm588_vm6, %v585_v58, %v517_v18  ;;  %v536_v22 = vsel %vm520_vm2, %v1532_v44, %v407_v51 }
  0xcf   : > { %1192 = vmatprep.mubr.msk.bf16.mxu0 %vm636_vm7, %v602_v29  ;;  %1211 = vmatmul.mubr.msk.bf16.gmra.mrb[8].mxu1 %vm636_vm7, %v602_v29 }
  0xd1   : > { %v448_v11 = vpop.permute.xlu0 %447  ;;  %v783_v19 = vpop.permute.xlu1 %782 }
  0xd2   : > { %v816_v23 = vsel %vm520_vm2, %v1455_v49, %v783_v19  ;;  %v553_v25 = vsel %vm537_vm3, %v536_v22, %v448_v11 }
  0xd5   : > { %v469_v20 = vpop.permute.xlu0 %468  ;;  %v785_v21 = vpop.permute.xlu1 %784 }
  0xd6   : > { %v818_v26 = vsel %vm537_vm3, %v816_v23, %v785_v21  ;;  %v570_v1 = vsel %vm554_vm4, %v553_v25, %v469_v20 }
  0xd9   : > { %v500_v24 = vpop.permute.xlu0 %499  ;;  %v792_v4 = vpop.permute.xlu1 %791 }
  0xda   : > { %v820_v27 = vsel %vm554_vm4, %v818_v26, %v792_v4  ;;  %v587_v28 = vsel %vm571_vm5, %v570_v1, %v500_v24 }
  0xdd   : > { %v519_v30 = vpop.permute.xlu0 %518  ;;  %v809_v31 = vpop.permute.xlu1 %808 }
  0xde   : > { %v604_v44 = vsel %vm588_vm6, %v587_v28, %v519_v30  ;;  %v822_v49 = vsel %vm571_vm5, %v820_v27, %v809_v31 }
  0xdf   : > { %1193 = vmatmul.mubr.msk.bf16.gmra.mrb[12].mxu0 %vm636_vm7, %v604_v44  ;;  %1214 = vmatprep.mubr.msk.bf16.mxu1 %vm636_vm7, %v604_v44 }
  0xe1   : > { %v814_v32 = vpop.permute.xlu0 %813 }
  0xe2   : > { %v824_v0 = vsel %vm588_vm6, %v822_v49, %v814_v32 }
  0xe3   : > { %1215 = vmatmul.mubr.msk.bf16.gmra.mrb[12].mxu1 %vm636_vm7, %v824_v0 }
 0x177   : > { %v1182_v34 = vpop.f32.mrb[0].mxu0 }
 0x178   : > { %v696_v35 = vadd.f32 %v1182_v34, %v1652_v33  ;;  %v687_v36 = vpop.f32.mrb[1].mxu0 }
 0x179   : > { %v688_v37 = vadd.f32 %v1652_v33, %v687_v36  ;;  %v1183_v38 = vpop.f32.mrb[2].mxu0 }
 0x17a   : > { %v1204_v39 = vpop.f32.mrb[0].mxu1  ;;  %v752_v40 = vmax.f32 %v696_v35, 0.0  ;;  %v699_v41 = vadd.f32 %v1183_v38, %v1652_v33  ;;  %v690_v43 = vpop.f32.mrb[3].mxu0 }
 0x17b   : > { %v902_v45 = vadd.f32 %v1204_v39, %v1652_v33  ;;  %v893_v46 = vpop.f32.mrb[1].mxu1  ;;  %v750_v47 = vmax.f32 %v688_v37, 0.0  ;;  %v691_v48 = vadd.f32 %v1652_v33, %v690_v43 }
 0x17c   : > { %v894_v50 = vadd.f32 %v1652_v33, %v893_v46  ;;  %v1205_v52 = vpop.f32.mrb[2].mxu1  ;;  %768 = vst.msk [vmem:[%s1658_s4 + $0x20] sm:$0xff] %vm537_vm3, %v752_v40  ;;  %v753_v53 = vmax.f32 %v699_v41, 0.0 }
 0x17d   : > { %v958_v54 = vmax.f32 %v902_v45, 0.0  ;;  %v905_v55 = vadd.f32 %v1205_v52, %v1652_v33  ;;  %v896_v57 = vpop.f32.mrb[3].mxu1  ;;  %766 = vst.msk [vmem:[%s1658_s4] sm:$0xff] %vm537_vm3, %v750_v47  ;;  %v751_v59 = vmax.f32 %v691_v48, 0.0 }
 0x17e   : > { %v956_v2 = vmax.f32 %v894_v50, 0.0  ;;  %v897_v60 = vadd.f32 %v1652_v33, %v896_v57  ;;  %769 = vst.msk [vmem:[%s1658_s4 + $0x28] sm:$0xff] %vm537_vm3, %v753_v53 }
 0x17f   : > { %1134 = vst.msk [vmem:[%s1658_s4 + $0x30] sm:$0xff] %vm537_vm3, %v958_v54  ;;  %v959_v42 = vmax.f32 %v905_v55, 0.0  ;;  %767 = vst.msk [vmem:[%s1658_s4 + $0x8] sm:$0xff] %vm537_vm3, %v751_v59 }
 0x180   : > { %1132 = vst.msk [vmem:[%s1658_s4 + $0x10] sm:$0xff] %vm537_vm3, %v956_v2  ;;  %v957_v61 = vmax.f32 %v897_v60, 0.0 }
 0x181   : > { %1135 = vst.msk [vmem:[%s1658_s4 + $0x38] sm:$0xff] %vm537_vm3, %v959_v42 }
 0x182   : > { %1133 = vst.msk [vmem:[%s1658_s4 + $0x18] sm:$0xff] %vm537_vm3, %v957_v61 }
 0x18a   : > { %v1186_v62 = vpop.f32.mrb[4].mxu0 }
 0x18b   : > { %v712_v63 = vadd.f32 %v1186_v62, %v1652_v33  ;;  %v703_v3 = vpop.f32.mrb[5].mxu0 }
 0x18c   : > { %v704_v5 = vadd.f32 %v1652_v33, %v703_v3  ;;  %v1187_v6 = vpop.f32.mrb[6].mxu0 }
 0x18d   : > { %v756_v8 = vmax.f32 %v712_v63, 0.0  ;;  %v715_v9 = vadd.f32 %v1187_v6, %v1652_v33  ;;  %v706_v10 = vpop.f32.mrb[7].mxu0 }
 0x18e   : > { %v1208_v7 = vpop.f32.mrb[4].mxu1  ;;  %v754_v13 = vmax.f32 %v704_v5, 0.0  ;;  %v707_v14 = vadd.f32 %v1652_v33, %v706_v10 }
 0x18f   : > { %v918_v56 = vadd.f32 %v1208_v7, %v1652_v33  ;;  %v909_v12 = vpop.f32.mrb[5].mxu1  ;;  %772 = vst.msk [vmem:[%s1658_s4 + $0x60] sm:$0xff] %vm537_vm3, %v756_v8  ;;  %v757_v17 = vmax.f32 %v715_v9, 0.0 }
 0x190   : > { %v910_v15 = vadd.f32 %v1652_v33, %v909_v12  ;;  %v1209_v16 = vpop.f32.mrb[6].mxu1  ;;  %770 = vst.msk [vmem:[%s1658_s4 + $0x40] sm:$0xff] %vm537_vm3, %v754_v13  ;;  %v755_v51 = vmax.f32 %v707_v14, 0.0 }
 0x191   : > { %v962_v58 = vmax.f32 %v918_v56, 0.0  ;;  %v921_v18 = vadd.f32 %v1209_v16, %v1652_v33  ;;  %v912_v29 = vpop.f32.mrb[7].mxu1  ;;  %773 = vst.msk [vmem:[%s1658_s4 + $0x68] sm:$0xff] %vm537_vm3, %v757_v17 }
 0x192   : > { %v960_v11 = vmax.f32 %v910_v15, 0.0  ;;  %v913_v19 = vadd.f32 %v1652_v33, %v912_v29  ;;  %771 = vst.msk [vmem:[%s1658_s4 + $0x48] sm:$0xff] %vm537_vm3, %v755_v51 }
 0x193   : > { %1138 = vst.msk [vmem:[%s1658_s4 + $0x70] sm:$0xff] %vm537_vm3, %v962_v58  ;;  %v963_v20 = vmax.f32 %v921_v18, 0.0 }
 0x194   : > { %1136 = vst.msk [vmem:[%s1658_s4 + $0x50] sm:$0xff] %vm537_vm3, %v960_v11  ;;  %v961_v21 = vmax.f32 %v913_v19, 0.0 }
 0x195   : > { %1139 = vst.msk [vmem:[%s1658_s4 + $0x78] sm:$0xff] %vm537_vm3, %v963_v20 }
 0x196   : > { %1137 = vst.msk [vmem:[%s1658_s4 + $0x58] sm:$0xff] %vm537_vm3, %v961_v21 }
 0x19e   : > { %v1190_v22 = vpop.f32.mrb[8].mxu0 }
 0x19f   : > { %v728_v23 = vadd.f32 %v1190_v22, %v1652_v33  ;;  %v719_v24 = vpop.f32.mrb[9].mxu0 }
 0x1a0   : > { %v720_v25 = vadd.f32 %v1652_v33, %v719_v24  ;;  %v1191_v26 = vpop.f32.mrb[10].mxu0 }
 0x1a1   : > { %v760_v1 = vmax.f32 %v728_v23, 0.0  ;;  %v731_v27 = vadd.f32 %v1191_v26, %v1652_v33  ;;  %v722_v28 = vpop.f32.mrb[11].mxu0 }
 0x1a2   : > { %v1212_v4 = vpop.f32.mrb[8].mxu1  ;;  %v758_v31 = vmax.f32 %v720_v25, 0.0  ;;  %v723_v49 = vadd.f32 %v1652_v33, %v722_v28 }
 0x1a3   : > { %v934_v30 = vadd.f32 %v1212_v4, %v1652_v33  ;;  %v925_v44 = vpop.f32.mrb[9].mxu1  ;;  %776 = vst.msk [vmem:[%s1658_s4 + $0xa0] sm:$0xff] %vm537_vm3, %v760_v1  ;;  %v761_v34 = vmax.f32 %v731_v27, 0.0 }
 0x1a4   : > { %v926_v32 = vadd.f32 %v1652_v33, %v925_v44  ;;  %v1213_v0 = vpop.f32.mrb[10].mxu1  ;;  %774 = vst.msk [vmem:[%s1658_s4 + $0x80] sm:$0xff] %vm537_vm3, %v758_v31  ;;  %v759_v38 = vmax.f32 %v723_v49, 0.0 }
 0x1a5   : > { %v966_v35 = vmax.f32 %v934_v30, 0.0  ;;  %v937_v36 = vadd.f32 %v1213_v0, %v1652_v33  ;;  %v928_v37 = vpop.f32.mrb[11].mxu1  ;;  %777 = vst.msk [vmem:[%s1658_s4 + $0xa8] sm:$0xff] %vm537_vm3, %v761_v34 }
 0x1a6   : > { %v964_v39 = vmax.f32 %v926_v32, 0.0  ;;  %v929_v40 = vadd.f32 %v1652_v33, %v928_v37  ;;  %775 = vst.msk [vmem:[%s1658_s4 + $0x88] sm:$0xff] %vm537_vm3, %v759_v38 }
 0x1a7   : > { %1142 = vst.msk [vmem:[%s1658_s4 + $0xb0] sm:$0xff] %vm537_vm3, %v966_v35  ;;  %v967_v41 = vmax.f32 %v937_v36, 0.0 }
 0x1a8   : > { %1140 = vst.msk [vmem:[%s1658_s4 + $0x90] sm:$0xff] %vm537_vm3, %v964_v39  ;;  %v965_v43 = vmax.f32 %v929_v40, 0.0 }
 0x1a9   : > { %1143 = vst.msk [vmem:[%s1658_s4 + $0xb8] sm:$0xff] %vm537_vm3, %v967_v41 }
 0x1aa   : > { %1141 = vst.msk [vmem:[%s1658_s4 + $0x98] sm:$0xff] %vm537_vm3, %v965_v43 }
 0x1b2   : > { %v1194_v45 = vpop.f32.mrb[12].mxu0 }
 0x1b3   : > { %v744_v46 = vadd.f32 %v1194_v45, %v1652_v33  ;;  %v735_v47 = vpop.f32.mrb[13].mxu0 }
 0x1b4   : > { %v736_v48 = vadd.f32 %v1652_v33, %v735_v47  ;;  %v1195_v50 = vpop.f32.mrb[14].mxu0 }
 0x1b5   : > { %v764_v52 = vmax.f32 %v744_v46, 0.0  ;;  %v747_v53 = vadd.f32 %v1195_v50, %v1652_v33  ;;  %v738_v54 = vpop.f32.mrb[15].mxu0 }
 0x1b6   : > { %v762_v55 = vmax.f32 %v736_v48, 0.0  ;;  %v739_v57 = vadd.f32 %v1652_v33, %v738_v54  ;;  %v1216_v59 = vpop.f32.mrb[12].mxu1 }
 0x1b7   : > { %780 = vst.msk [vmem:[%s1658_s4 + $0xe0] sm:$0xff] %vm537_vm3, %v764_v52  ;;  %v765_v2 = vmax.f32 %v747_v53, 0.0  ;;  %v950_v60 = vadd.f32 %v1216_v59, %v1652_v33  ;;  %v941_v42 = vpop.f32.mrb[13].mxu1 }
 0x1b8   : > { %778 = vst.msk [vmem:[%s1658_s4 + $0xc0] sm:$0xff] %vm537_vm3, %v762_v55  ;;  %v763_v61 = vmax.f32 %v739_v57, 0.0  ;;  %v942_v62 = vadd.f32 %v1652_v33, %v941_v42  ;;  %v1217_v63 = vpop.f32.mrb[14].mxu1 }
 0x1b9   : > { %781 = vst.msk [vmem:[%s1658_s4 + $0xe8] sm:$0xff] %vm537_vm3, %v765_v2  ;;  %v970_v3 = vmax.f32 %v950_v60, 0.0  ;;  %v953_v5 = vadd.f32 %v1217_v63, %v1652_v33  ;;  %v944_v6 = vpop.f32.mrb[15].mxu1 }
 0x1ba   : > { %779 = vst.msk [vmem:[%s1658_s4 + $0xc8] sm:$0xff] %vm537_vm3, %v763_v61  ;;  %v968_v7 = vmax.f32 %v942_v62, 0.0  ;;  %v945_v8 = vadd.f32 %v1652_v33, %v944_v6 }
 0x1bb   : > { %1146 = vst.msk [vmem:[%s1658_s4 + $0xf0] sm:$0xff] %vm537_vm3, %v970_v3  ;;  %v971_v9 = vmax.f32 %v953_v5, 0.0 }
 0x1bc   : > { %1144 = vst.msk [vmem:[%s1658_s4 + $0xd0] sm:$0xff] %vm537_vm3, %v968_v7  ;;  %v969_v10 = vmax.f32 %v945_v8, 0.0 }
 0x1bd   : > { %1147 = vst.msk [vmem:[%s1658_s4 + $0xf8] sm:$0xff] %vm537_vm3, %v971_v9 }
 0x1be   : > { %1145 = vst.msk [vmem:[%s1658_s4 + $0xd8] sm:$0xff] %vm537_vm3, %v969_v10 }
 0x1bf PF: > { %s13_s16 = sadd.s32 1, %s1328_s16   ;;  %s1774_s12 = smov %s1320_s14 }
 0x1c0   : > { %p10_p7 = scmp.ge.s32.totalorder %s13_s16, 6   ;;  %s1775_s13 = smov %s1324_s15 }
 0x1c1   : > { %s1776_s14 = smov %s1779_s17  ;;  %s1777_s15 = smov %s1783_s18 }
 0x1c2   :  { %12 = sbr.rel (!%p10_p7) target bundleno = 3 (0x3), region = 65 }

</bundles_post_ra>
